<compile_context>
chip_gen: v7x
topology: tpu7x:2x2x1
jax: 0.10.0
libtpu: 0.0.40
codegen_flags: <defaults>
</compile_context>

<pallas_src>
import functools

import jax
import jax.numpy as jnp
from jax.experimental import pallas as pl
from jax.experimental.pallas import tpu as pltpu  # noqa: F401  (TPU backend)


# ---------------------------------------------------------------------------
# Fused kernel: batched spectral MLP + BatchNorm + ReLU + residual
# ---------------------------------------------------------------------------
def spec_layer_kernel(feat_ref, eig_ref, eig_t_ref, w1_ref, b1_ref, w2_ref,
                      b2_ref, o_ref, *, residual):
    G, N, I = feat_ref.shape
    E = eig_ref.shape[-1]
    O = o_ref.shape[-1]

    feat = feat_ref[...]          # [G, N, I]
    eig = eig_ref[...]            # [G, N, E]
    eig_t = eig_t_ref[...]        # [G, E, N]  (transposed once in the wrapper)

    # ---- spectral projection (batched MXU matmul, no in-kernel transpose) ----
    # spec_in[g, e, i] = sum_n eig[g, n, e] * feat[g, n, i]
    spec_in = jnp.einsum('gen,gni->gei', eig_t, feat,
                         preferred_element_type=jnp.float32)          # [G, E, I]

    # ---- grouped per-eigenvector 2-layer MLP as two plain MXU matmuls -------
    # Block-diagonal W1_bd/W2_bd make the per-eigenvector grouping a single
    # wide matmul (lane dim E*I / E*K instead of I / K) instead of a VPU
    # broadcast-multiply + XLU sublane reduction per graph.
    spec_in_flat = spec_in.reshape(G, E * I)                          # [G, E*I]
    hidden = jnp.dot(spec_in_flat, w1_ref[...],
                     preferred_element_type=jnp.float32) + b1_ref[...]   # [G, E*K]
    hidden = jnp.maximum(hidden, 0.0)                                 # hidden_activation
    spec_out_flat = jnp.dot(hidden, w2_ref[...],
                            preferred_element_type=jnp.float32) + b2_ref[...]  # [G, E*O]
    spec_out = spec_out_flat.reshape(G, E, O)                         # [G, E, O]

    # ---- back-projection (batched MXU matmul) -------------------------------
    # h[g, n, o] = sum_e eig[g, n, e] * spec_out[g, e, o]
    h = jnp.einsum('gne,geo->gno', eig, spec_out,
                   preferred_element_type=jnp.float32)                # [G, N, O]

    # ---- BatchNorm1d over all G*N rows: one reduce, one normalize -----------
    # (PyTorch train-mode biased batch statistics, gamma=1, beta=0, eps=1e-5.)
    inv_n = 1.0 / (G * N)
    col_sum = jnp.sum(h, axis=(0, 1), keepdims=True)                  # [1, 1, O]
    col_sumsq = jnp.sum(h * h, axis=(0, 1), keepdims=True)            # [1, 1, O]
    mean = col_sum * inv_n
    var = col_sumsq * inv_n - mean * mean                             # biased variance
    inv_std = jax.lax.rsqrt(var + 1e-5)                               # one EUP rsqrt

    out = jnp.maximum((h - mean) * inv_std, 0.0)                      # BN + F.relu
    if residual:                                                      # only when I == O
        out = out + feat
    # dropout(p=0.0) is the identity — nothing to do.
    o_ref[...] = out                                                  # single full-block store


# ---------------------------------------------------------------------------
# Wrapper
# ---------------------------------------------------------------------------
def _block_diag(w):
    """[E, A, B] grouped weights -> block-diagonal [E*A, E*B] matrix."""
    E, A, B = w.shape
    eye = jnp.eye(E, dtype=w.dtype)
    return jnp.einsum('eab,ef->eafb', w, eye).reshape(E * A, E * B)


@jax.jit
def spec_layer_forward(feat, eig, w1, b1, w2, b2):
    G, N, I = feat.shape
    E = eig.shape[-1]
    K = w1.shape[-1]
    O = w2.shape[-1]
    # SpecLayer disables the residual when in_dim != out_dim.
    residual = (I == O)

    # One-time parameter / layout plumbing in plain JAX (outside the kernel).
    eig_t = jnp.transpose(eig, (0, 2, 1))          # [G, E, N]
    w1_bd = _block_diag(w1)                        # [E*I, E*K]
    w2_bd = _block_diag(w2)                        # [E*K, E*O]
    b1_flat = b1.reshape(1, E * K)
    b2_flat = b2.reshape(1, E * O)

    kernel = functools.partial(spec_layer_kernel, residual=residual)

    out = pl.pallas_call(
        kernel,
        out_shape=jax.ShapeDtypeStruct((G, N, O), jnp.float32),
        # No grid: the whole problem is a few KB, fully resident in VMEM;
        # full-extent blocks for every operand, one invocation.
        in_specs=[
            pl.BlockSpec((G, N, I), lambda: (0, 0, 0)),
            pl.BlockSpec((G, N, E), lambda: (0, 0, 0)),
            pl.BlockSpec((G, E, N), lambda: (0, 0, 0)),
            pl.BlockSpec((E * I, E * K), lambda: (0, 0)),
            pl.BlockSpec((1, E * K), lambda: (0, 0)),
            pl.BlockSpec((E * K, E * O), lambda: (0, 0)),
            pl.BlockSpec((1, E * O), lambda: (0, 0)),
        ],
        out_specs=pl.BlockSpec((G, N, O), lambda: (0, 0, 0)),
    )(feat, eig, eig_t, w1_bd, b1_flat, w2_bd, b2_flat)
    # Present the PyTorch [G*N, O] row-concatenated output (free XLA reshape).
    return out.reshape(G * N, O)


# ---------------------------------------------------------------------------
# Preprocessing glue: Laplacian eigenvectors of a simple ring graph.
# (Replaces SpecLayer._get_eigenvectors, which uses torch.eig + DGL caching.)
# ---------------------------------------------------------------------------
def ring_graph_eigenvectors(num_nodes, num_eigs):
    idx = jnp.arange(num_nodes)
    adj = (
        jnp.zeros((num_nodes, num_nodes), jnp.float32)
        .at[idx, (idx + 1) % num_nodes].set(1.0)
        .at[(idx + 1) % num_nodes, idx].set(1.0)
    )
    lap = jnp.diag(adj.sum(axis=1)) - adj
    evals, evecs = jnp.linalg.eigh(lap)            # ascending eigenvalues
    evecs = evecs[:, :num_eigs]
    if evecs.shape[1] < num_eigs:                  # pad if too few eigenvectors
        pad = jnp.zeros((num_nodes, num_eigs - evecs.shape[1]), jnp.float32)
        evecs = jnp.concatenate([evecs, pad], axis=1)
    return evecs.astype(jnp.float32)


if __name__ == "__main__":
    # Small config consistent with the module:
    #   group_by='eigen', num_eigs=4, hidden_dim=8, in_dim=out_dim=8 (residual on)
    G, N = 2, 16          # 2 graphs, 16 nodes each
    I = O = 8             # in_channels == out_channels
    E = 4                 # SpecLayer.num_eigs
    K = 8                 # SpecLayer.hidden_dim

    key = jax.random.PRNGKey(0)
    k_feat, k_w1, k_w2 = jax.random.split(key, 3)

    feat = jax.random.normal(k_feat, (G, N, I), jnp.float32)

    # Deterministic parameter init (torch.randn equivalents; biases start at 0).
    w1 = jax.random.normal(k_w1, (E, I, K), jnp.float32)
    b1 = jnp.zeros((E, K), jnp.float32)
    w2 = jax.random.normal(k_w2, (E, K, O), jnp.float32)
    b2 = jnp.zeros((E, O), jnp.float32)

    # Same ring-graph eigenvectors for each graph in the batch.
    evecs = ring_graph_eigenvectors(N, E)
    eig = jnp.broadcast_to(evecs[None], (G, N, E)).astype(jnp.float32)

    out = spec_layer_forward(feat, eig, w1, b1, w2, b2)
    jax.block_until_ready(out)

    assert out.shape == (G * N, O)
    print("KERNEL_OK")
</pallas_src>

<mosaic_0001>
module attributes {stable_mosaic.version = 11 : i64} {
  func.func @spec_layer_kernel(%arg0: memref<2x16x8xf32, #tpu.memory_space<vmem>>, %arg1: memref<2x16x4xf32, #tpu.memory_space<vmem>>, %arg2: memref<2x4x16xf32, #tpu.memory_space<vmem>>, %arg3: memref<32x32xf32, #tpu.memory_space<vmem>>, %arg4: memref<1x32xf32, #tpu.memory_space<vmem>>, %arg5: memref<32x32xf32, #tpu.memory_space<vmem>>, %arg6: memref<1x32xf32, #tpu.memory_space<vmem>>, %arg7: memref<2x16x8xf32, #tpu.memory_space<vmem>>) attributes {dimension_semantics = [], scalar_prefetch = 0 : i64, scratch_operands = 0 : i64, tpu.core_type = #tpu.core_type<tc>} {
    %c0 = arith.constant 0 : index
    %c0_0 = arith.constant 0 : index
    %c0_1 = arith.constant 0 : index
    %0 = vector.load %arg0[%c0, %c0_0, %c0_1] : memref<2x16x8xf32, #tpu.memory_space<vmem>>, vector<2x16x8xf32>
    %c0_2 = arith.constant 0 : index
    %c0_3 = arith.constant 0 : index
    %c0_4 = arith.constant 0 : index
    %1 = vector.load %arg1[%c0_2, %c0_3, %c0_4] : memref<2x16x4xf32, #tpu.memory_space<vmem>>, vector<2x16x4xf32>
    %c0_5 = arith.constant 0 : index
    %c0_6 = arith.constant 0 : index
    %c0_7 = arith.constant 0 : index
    %2 = vector.load %arg2[%c0_5, %c0_6, %c0_7] : memref<2x4x16xf32, #tpu.memory_space<vmem>>, vector<2x4x16xf32>
    "tpu.trace_start"() <{level = 10 : i32, message = "gen,gni->gei"}> : () -> ()
    %cst = arith.constant dense<0.000000e+00> : vector<2x4x8xf32>
    %3 = tpu.matmul %2, %0, %cst {dimension_numbers = #tpu.dot_dimension_numbers<[2], [1], [1], [2], [0, 0, 0, 1, 1, 2], [0], [0]>} : vector<2x4x16xf32>, vector<2x16x8xf32>, vector<2x4x8xf32> -> vector<2x4x8xf32>
    "tpu.trace_stop"() : () -> ()
    %4 = vector.shape_cast %3 : vector<2x4x8xf32> to vector<2x32xf32>
    %c0_8 = arith.constant 0 : index
    %c0_9 = arith.constant 0 : index
    %5 = vector.load %arg3[%c0_8, %c0_9] : memref<32x32xf32, #tpu.memory_space<vmem>>, vector<32x32xf32>
    %cst_10 = arith.constant dense<0.000000e+00> : vector<2x32xf32>
    %6 = tpu.matmul %4, %5, %cst_10 {dimension_numbers = #tpu.dot_dimension_numbers<[1], [0], [0], [1], [0, 0, 1, 1], [], []>} : vector<2x32xf32>, vector<32x32xf32>, vector<2x32xf32> -> vector<2x32xf32>
    %c0_11 = arith.constant 0 : index
    %c0_12 = arith.constant 0 : index
    %7 = vector.load %arg4[%c0_11, %c0_12] : memref<1x32xf32, #tpu.memory_space<vmem>>, vector<1x32xf32>
    %8 = vector.broadcast %7 : vector<1x32xf32> to vector<2x32xf32>
    %9 = arith.addf %6, %8 : vector<2x32xf32>
    %cst_13 = arith.constant 0.000000e+00 : f32
    %10 = vector.broadcast %cst_13 : f32 to vector<2x32xf32>
    %11 = arith.maximumf %9, %10 : vector<2x32xf32>
    %c0_14 = arith.constant 0 : index
    %c0_15 = arith.constant 0 : index
    %12 = vector.load %arg5[%c0_14, %c0_15] : memref<32x32xf32, #tpu.memory_space<vmem>>, vector<32x32xf32>
    %cst_16 = arith.constant dense<0.000000e+00> : vector<2x32xf32>
    %13 = tpu.matmul %11, %12, %cst_16 {dimension_numbers = #tpu.dot_dimension_numbers<[1], [0], [0], [1], [0, 0, 1, 1], [], []>} : vector<2x32xf32>, vector<32x32xf32>, vector<2x32xf32> -> vector<2x32xf32>
    %c0_17 = arith.constant 0 : index
    %c0_18 = arith.constant 0 : index
    %14 = vector.load %arg6[%c0_17, %c0_18] : memref<1x32xf32, #tpu.memory_space<vmem>>, vector<1x32xf32>
    %15 = vector.broadcast %14 : vector<1x32xf32> to vector<2x32xf32>
    %16 = arith.addf %13, %15 : vector<2x32xf32>
    %17 = vector.shape_cast %16 : vector<2x32xf32> to vector<2x4x8xf32>
    "tpu.trace_start"() <{level = 10 : i32, message = "gne,geo->gno"}> : () -> ()
    %cst_19 = arith.constant dense<0.000000e+00> : vector<2x16x8xf32>
    %18 = tpu.matmul %1, %17, %cst_19 {dimension_numbers = #tpu.dot_dimension_numbers<[2], [1], [1], [2], [0, 0, 0, 1, 1, 2], [0], [0]>} : vector<2x16x4xf32>, vector<2x4x8xf32>, vector<2x16x8xf32> -> vector<2x16x8xf32>
    "tpu.trace_stop"() : () -> ()
    %cst_20 = arith.constant dense<0.000000e+00> : vector<8xf32>
    %19 = vector.multi_reduction <add>, %18, %cst_20 [0, 1] : vector<2x16x8xf32> to vector<8xf32>
    %20 = vector.shape_cast %19 : vector<8xf32> to vector<1x1x8xf32>
    %21 = arith.mulf %18, %18 : vector<2x16x8xf32>
    %cst_21 = arith.constant dense<0.000000e+00> : vector<8xf32>
    %22 = vector.multi_reduction <add>, %21, %cst_21 [0, 1] : vector<2x16x8xf32> to vector<8xf32>
    %23 = vector.shape_cast %22 : vector<8xf32> to vector<1x1x8xf32>
    %cst_22 = arith.constant 3.125000e-02 : f32
    %24 = vector.broadcast %cst_22 : f32 to vector<1x1x8xf32>
    %25 = arith.mulf %20, %24 : vector<1x1x8xf32>
    %cst_23 = arith.constant 3.125000e-02 : f32
    %26 = vector.broadcast %cst_23 : f32 to vector<1x1x8xf32>
    %27 = arith.mulf %23, %26 : vector<1x1x8xf32>
    %28 = arith.mulf %25, %25 : vector<1x1x8xf32>
    %29 = arith.subf %27, %28 : vector<1x1x8xf32>
    %cst_24 = arith.constant 9.99999974E-6 : f32
    %30 = vector.broadcast %cst_24 : f32 to vector<1x1x8xf32>
    %31 = arith.addf %29, %30 : vector<1x1x8xf32>
    %32 = math.rsqrt %31 : vector<1x1x8xf32>
    %33 = vector.broadcast %25 : vector<1x1x8xf32> to vector<2x16x8xf32>
    %34 = arith.subf %18, %33 : vector<2x16x8xf32>
    %35 = vector.broadcast %32 : vector<1x1x8xf32> to vector<2x16x8xf32>
    %36 = arith.mulf %34, %35 : vector<2x16x8xf32>
    %cst_25 = arith.constant 0.000000e+00 : f32
    %37 = vector.broadcast %cst_25 : f32 to vector<2x16x8xf32>
    %38 = arith.maximumf %36, %37 : vector<2x16x8xf32>
    %39 = arith.addf %38, %0 : vector<2x16x8xf32>
    %c0_26 = arith.constant 0 : index
    %c0_27 = arith.constant 0 : index
    %c0_28 = arith.constant 0 : index
    %40 = vector.load %arg7[%c0_26, %c0_27, %c0_28] : memref<2x16x8xf32, #tpu.memory_space<vmem>>, vector<2x16x8xf32>
    tpu.vector_store %arg7[%c0_26, %c0_27, %c0_28], %39 {strides = array<i32>} : memref<2x16x8xf32, #tpu.memory_space<vmem>>, vector<2x16x8xf32>,
    return
  }
}

</mosaic_0001>

<bundles_post_ra>
// kernel: spec_layer_forward.1
= control target key start
LH: loop header
LB: loop body
LE: loop exit
PB: predicated region body
PF: predicated region fallthrough
CT: control target
= control target key end

     0   :  { %v778_v0 = vmov 0.0|0.0   ;;  %vm779_vm0 = vmmov 0   ;;  %v780_v6 = vmov 0.0   ;;  %vm36_vm1 = vcmask 130048   ;;  %s783_s22 = smov 24   ;;  %s784_s23 = smov 8   ;;  %s955_s0 = inlined_call_operand.vmem [shape: f32[2,16,8], index: 0, kind: input, shape index: {}]   ;;  %s956_s2 = inlined_call_operand.vmem [shape: f32[2,4,16], index: 2, kind: input, shape index: {}]   ;;  %s957_s3 = inlined_call_operand.vmem [shape: f32[32,32], index: 3, kind: input, shape index: {}]   ;;  %s958_s5 = inlined_call_operand.vmem [shape: f32[32,32], index: 5, kind: input, shape index: {}]   ;;  %s959_s4 = inlined_call_operand.vmem [shape: f32[1,32], index: 4, kind: input, shape index: {}]   ;;  %s960_s6 = inlined_call_operand.vmem [shape: f32[1,32], index: 6, kind: input, shape index: {}]   ;;  %s961_s1 = inlined_call_operand.vmem [shape: f32[2,16,4], index: 1, kind: input, shape index: {}]   ;;  %s962_s7 = inlined_call_operand.vmem [shape: f32[2,16,8], index: 7, kind: output, shape index: {}]  }
   0x1   :  { %747 = vmatprep.subr.bf16.mxu0 %v778_v0  ;;  %750 = vmatprep.subr.bf16.mxu1 %v778_v0  ;;  %v832_v1 = vld [vmem:[%s955_s0] sm:$0xff]  ;;  %v837_v2 = vld [vmem:[%s955_s0 + $0x8] sm:$0xff]  ;;  %v842_v3 = vld [vmem:[%s955_s0 + $0x10] sm:$0xff]  ;;  %v781_v13 = vmov 1983009808   ;;  %v186_v15 = vlaneseq  ;;  %s785_s24 = smov 16  }
   0x2   :  { %v748_v4 = vpack.c.bf16 %v837_v2, %v832_v1  ;;  %v849_v5 = vld [vmem:[%s955_s0 + $0x18] sm:$0xff]  ;;  %705 = vmatprep.mubr.msk.f32.mxu0 %vm779_vm0, %v780_v6  ;;  %712 = vmatprep.mubr.msk.f32.mxu1 %vm779_vm0, %v780_v6  ;;  %v34_v8 = vld [vmem:[%s956_s2] sm:$0xf]  ;;  %v35_v9 = vld [vmem:[%s956_s2 + $0x4] sm:$0xf]  ;;  %v184_v14 = vunpack.c.l.s4 %v781_v13  ;;  %vm227_vm2 = vcmask 64512  }
   0x3   :  { %v751_v7 = vpack.c.bf16 %v849_v5, %v842_v3  ;;  %v232_v10 = vld [vmem:[%s957_s3] sm:$0xff]  ;;  %v233_v11 = vld [vmem:[%s957_s3 + $0x8] sm:$0xff]  ;;  %v187_v17 = vshrl.u32 %v186_v15, 7  ;;  %v782_v18 = vmov 1934713408   ;;  %v234_v21 = vld [vmem:[%s957_s3 + $0x10] sm:$0xff] }
   0x4   :  { %749 = vmatpush3.bf16.msra.mxu0 %v748_v4  ;;  %v754_v12 = vpack.c.bf16 %v233_v11, %v232_v10  ;;  %v185_v16 = vunpack.c.0.s8 %v184_v14  ;;  %v200_v19 = vunpack.c.l.s4 %v782_v18  ;;  %v235_v22 = vld [vmem:[%s957_s3 + $0x18] sm:$0xff]  ;;  %v318_v34 = vld [vmem:[%s958_s5] sm:$0xff]  ;;  %v319_v35 = vld [vmem:[%s958_s5 + $0x8] sm:$0xff]  ;;  %vm230_vm3 = vcmask 195584   ;;  %s786_s11 = smov 112  }
   0x5   :  { %752 = vmatpush3.bf16.msra.mxu1 %v751_v7  ;;  %753 = vmatprep.subr.bf16.mxu0 %v778_v0  ;;  %v757_v24 = vpack.c.bf16 %v235_v22, %v234_v21  ;;  %v760_v36 = vpack.c.bf16 %v319_v35, %v318_v34  ;;  %vm243_vm4 = vcmask 261120   ;;  %v320_v47 = vld [vmem:[%s958_s5 + $0x10] sm:$0xff]  ;;  %v321_v48 = vld [vmem:[%s958_s5 + $0x18] sm:$0xff]  ;;  %v669_v50 = vld [vmem:[%s959_s4] ss:$0 sm:$0xff]  ;;  %vm437_vm5 = vcmask 31744  }
   0x6   :  { %759 = vmatprep.subr.bf16.mxu1 %v778_v0  ;;  %v871_v20 = vsub.s32 %v185_v16, %v187_v17  ;;  %v201_v23 = vunpack.c.0.s8 %v200_v19  ;;  %v763_v49 = vpack.c.bf16 %v321_v48, %v320_v47  ;;  %v671_v55 = vld [vmem:[%s960_s6] ss:$0 sm:$0xff]  ;;  %s787_s4 = smov 120   ;;  %v32_v60 = vld [vmem:[%s961_s1 + $0x10] sm:$0xff]  ;;  %s788_s6 = smov 104   ;;  %vm444_vm6 = vcmask 1043456  }
   0x7   :  { %706 = vmatmul.mubr.msk.f32.vlgmr.msra.gmra.mrb[0].mxu0 %vm36_vm1, %v34_v8  ;;  %v30_v59 = vld [vmem:[%s961_s1] sm:$0xff]  ;;  %v31_v11 = vld [vmem:[%s961_s1 + $0x8] sm:$0xff]  ;;  %v33_v13 = vld [vmem:[%s961_s1 + $0x18] sm:$0xff] }
   0x8   :  { %713 = vmatmul.mubr.msk.f32.vlgmr.msra.gmra.mrb[0].mxu1 %vm36_vm1, %v35_v9  ;;  %723 = vmatprep.mubr.msk.f32.mxu0 %vm779_vm0, %v780_v6  ;;  %v881_v31 = vsub.s32 %v201_v23, %v187_v17 }
   0x9   :  { %734 = vmatprep.mubr.msk.f32.mxu1 %vm779_vm0, %v780_v6  ;;  %755 = vmatpush3.bf16.msra.mxu0 %v754_v12 }
   0xa   :  { %756 = vmatprep.subr.bf16.mxu0 %v778_v0  ;;  %761 = vmatpush3.bf16.msra.mxu1 %v760_v36 }
   0xb   :  { %762 = vmatprep.subr.bf16.mxu1 %v778_v0 }
   0xd   :  { %758 = vmatpush3.bf16.msra.mxu0 %v757_v24 }
   0xe   :  { %764 = vmatpush3.bf16.msra.mxu1 %v763_v49 }
  0xda   :  { %v106_v25 = vpop.f32.mrb[0].mxu0 }
  0xdb   :  { %v189_v26 = vrot.slane %v106_v25, %v871_v20  ;;  %v179_v27 = vpop.f32.mrb[0].mxu1  ;;  %v707_v28 = vpop.f32.mrb[1].mxu0 }
  0xdc   :  { %v196_v29 = vrot.slane %v179_v27, %v871_v20  ;;  %v714_v30 = vpop.f32.mrb[1].mxu1 }
  0xde   :  { %v197_v32 = vcombine.low %v189_v26, %v196_v29  ;;  %v198_v33 = vcombine.high %v189_v26, %v196_v29 }
  0xe0   :  { %v212_v37 = vrot.slane %v198_v33, %v881_v31  ;;  %v205_v38 = vrot.slane %v197_v32, %v881_v31 }
  0xe2   :  { %v214_v39 = vcombine.high %v212_v37, %v780_v6  ;;  %v213_v40 = vcombine.high %v205_v38, %v780_v6 }
  0xe4   :  { %224 = vrot.lane.b32.xlu1 %v214_v39, %s783_s22  ;;  %216 = vrot.lane.b32.xlu0 %v213_v40, %s784_s23 }
  0xe8   :  { %220 = vrot.lane.b32.xlu0 %v212_v37, %s785_s24 }
 0x156   :  { %v217_v41 = vpop.permute.xlu0 %216  ;;  %v225_v44 = vpop.permute.xlu1 %224 }
 0x157   :  { %v228_v42 = vsel %vm227_vm2, %v205_v38, %v217_v41 }
 0x15a   :  { %v221_v43 = vpop.permute.xlu0 %220 }
 0x15b   :  { %v229_v45 = vsel %vm36_vm1, %v228_v42, %v221_v43 }
 0x15c   :  { %v231_v46 = vsel %vm230_vm3, %v229_v45, %v225_v44 }
 0x15d   :  { %724 = vmatmul.mubr.msk.f32.vlgmr.msra.gmra.mrb[2].mxu0 %vm243_vm4, %v231_v46 }
 0x15e   :  { %739 = vmatprep.mubr.msk.f32.mxu0 %vm437_vm5, %v30_v59 }
 0x230   :  { %v313_v51 = vpop.f32.mrb[2].mxu0 }
 0x231   :  { %v314_v52 = vadd.f32 %v669_v50, %v313_v51  ;;  %v725_v53 = vpop.f32.mrb[3].mxu0 }
 0x233   :  { %v317_v54 = vmax.f32 %v314_v52, 0.0 }
 0x235   :  { %735 = vmatmul.mubr.msk.f32.vlgmr.msra.gmra.mrb[2].mxu1 %vm243_vm4, %v317_v54 }
 0x236   :  { %744 = vmatprep.mubr.msk.f32.mxu1 %vm437_vm5, %v32_v60 }
 0x308   :  { %v398_v56 = vpop.f32.mrb[2].mxu1 }
 0x309   :  { %v399_v57 = vadd.f32 %v671_v55, %v398_v56  ;;  %v736_v58 = vpop.f32.mrb[3].mxu1 }
 0x30b   :  { %406 = vrot.lane.b32.xlu0 %v399_v57, %s786_s11  ;;  %403 = vrot.lane.b32.xlu1 %v399_v57, %s787_s4 }
 0x30f   :  { %409 = vrot.lane.b32.xlu1 %v399_v57, %s788_s6 }
 0x37d   :  { %v407_v61 = vpop.permute.xlu0 %406  ;;  %v404_v62 = vpop.permute.xlu1 %403 }
 0x37e   :  { %v412_v63 = vcombine.low %v399_v57, %v407_v61 }
 0x380   :  { %v419_v7 = vrot.slane %v412_v63, %v871_v20 }
 0x381   :  { %v410_v0 = vpop.permute.xlu1 %409 }
 0x382   :  { %v420_v4 = vcombine.low %v404_v62, %v410_v0 }
 0x384   :  { %v427_v8 = vrot.slane %v420_v4, %v871_v20 }
 0x386   :  { %v428_v9 = vcombine.low %v419_v7, %v427_v8 }
 0x388   :  { %v435_v10 = vrot.slane %v428_v9, %v881_v31 }
 0x38a   :  { %737 = vmatprep.subr.msk.mxu0 %vm444_vm6, %v435_v10  ;;  %v436_v12 = vcombine.high %v435_v10, %v780_v6 }
 0x38b   :  { %738 = vmatpush3.msk.msra.mxu0 %vm444_vm6, %v435_v10 }
 0x38c   :  { %740 = vmatmul.mubr.msk.f32.vlgmr.msra.gmra.mrb[4].mxu0 %vm437_vm5, %v31_v11  ;;  %742 = vmatprep.subr.msk.mxu1 %vm444_vm6, %v436_v12 }
 0x38d   :  { %743 = vmatpush3.msk.msra.mxu1 %vm444_vm6, %v436_v12 }
 0x38e   :  { %745 = vmatmul.mubr.msk.f32.vlgmr.msra.gmra.mrb[4].mxu1 %vm437_vm5, %v33_v13 }
 0x45f   :  { %v741_v14 = vpop.f32.mrb[4].mxu0 }
 0x460   :  { %v608_v15 = vsel %vm227_vm2, %v741_v14, 0.0  ;;  %v621_v16 = vmul.f32 %v741_v14, %v741_v14  ;;  %v514_v17 = vpop.f32.mrb[5].mxu0 }
 0x461   :  { %v607_v18 = vsel %vm227_vm2, %v514_v17, 0.0  ;;  %v620_v19 = vmul.f32 %v514_v17, %v514_v17  ;;  %v746_v6 = vpop.f32.mrb[4].mxu1 }
 0x462   :  { %v625_v20 = vsel %vm227_vm2, %v621_v16, 0.0  ;;  %v609_v21 = vadd.f32 %v608_v15, %v607_v18  ;;  %v598_v22 = vpop.f32.mrb[5].mxu1  ;;  %v623_v24 = vmul.f32 %v746_v6, %v746_v6  ;;  %v612_v29 = vsel %vm227_vm2, %v746_v6, 0.0 }
 0x463   :  { %v624_v23 = vsel %vm227_vm2, %v620_v19, 0.0  ;;  %v610_v25 = vsel %vm227_vm2, %v598_v22, 0.0  ;;  %v622_v26 = vmul.f32 %v598_v22, %v598_v22 }
 0x464   :  { %v626_v27 = vadd.f32 %v625_v20, %v624_v23  ;;  %v611_v28 = vadd.f32 %v610_v25, %v609_v21  ;;  %v629_v33 = vsel %vm227_vm2, %v623_v24, 0.0 }
 0x465   :  { %v627_v30 = vsel %vm227_vm2, %v622_v26, 0.0 }
 0x466   :  { %v613_v31 = vadd.f32 %v612_v29, %v611_v28  ;;  %v628_v32 = vadd.f32 %v627_v30, %v626_v27 }
 0x468   :  { %v614_v34 = vrot.slane %v613_v31, 4  ;;  %v630_v35 = vadd.f32 %v629_v33, %v628_v32 }
 0x46a   :  { %v615_v36 = vadd.f32 %v614_v34, %v613_v31  ;;  %v631_v37 = vrot.slane %v630_v35, 4 }
 0x46c   :  { %v616_v38 = vrot.slane %v615_v36, 2  ;;  %v632_v39 = vadd.f32 %v631_v37, %v630_v35 }
 0x46e   :  { %v617_v40 = vadd.f32 %v616_v38, %v615_v36  ;;  %v633_v41 = vrot.slane %v632_v39, 2 }
 0x470   :  { %v618_v42 = vrot.slane %v617_v40, 1  ;;  %v634_v43 = vadd.f32 %v633_v41, %v632_v39 }
 0x472   :  { %v619_v44 = vadd.f32 %v618_v42, %v617_v40  ;;  %v635_v45 = vrot.slane %v634_v43, 1 }
 0x474   :  { %v636_v46 = vadd.f32 %v635_v45, %v634_v43  ;;  %v637_v47 = vmul.f32 0.03125, %v619_v44 }
 0x476   :  { %v638_v48 = vmul.f32 0.03125, %v636_v46  ;;  %v639_v49 = vmul.f32 %v637_v47, %v637_v47  ;;  %v643_v50 = vsub.f32 %v514_v17, %v637_v47  ;;  %v644_v51 = vsub.f32 %v741_v14, %v637_v47 }
 0x477   :  { %v645_v52 = vsub.f32 %v598_v22, %v637_v47  ;;  %v646_v53 = vsub.f32 %v746_v6, %v637_v47 }
 0x478   :  { %v640_v54 = vsub.f32 %v638_v48, %v639_v49 }
 0x47a   :  { %v641_v55 = vadd.f32 1e-05, %v640_v54 }
 0x47c   :  { %776 = vrsqrt.f32 %v641_v55 }
 0x486   :  { %v777_v56 = vpop.eup %776 }
 0x487   :  { %v647_v57 = vmul.f32 %v777_v56, %v643_v50  ;;  %v648_v58 = vmul.f32 %v777_v56, %v644_v51  ;;  %v649_v59 = vmul.f32 %v777_v56, %v645_v52  ;;  %v650_v60 = vmul.f32 %v777_v56, %v646_v53 }
 0x489   :  { %v651_v61 = vmax.f32 %v647_v57, 0.0  ;;  %v652_v62 = vmax.f32 %v648_v58, 0.0  ;;  %v653_v63 = vmax.f32 %v649_v59, 0.0  ;;  %v654_v0 = vmax.f32 %v650_v60, 0.0 }
 0x48b   :  { %v655_v4 = vadd.f32 %v651_v61, %v832_v1  ;;  %v656_v7 = vadd.f32 %v652_v62, %v837_v2  ;;  %v657_v8 = vadd.f32 %v653_v63, %v842_v3  ;;  %v658_v9 = vadd.f32 %v654_v0, %v849_v5 }
 0x48d   :  { %659 = vst.msk [vmem:[%s962_s7] sm:$0xff] %vm227_vm2, %v655_v4  ;;  %660 = vst.msk [vmem:[%s962_s7 + $0x8] sm:$0xff] %vm227_vm2, %v656_v7 }
 0x48e   :  { %661 = vst.msk [vmem:[%s962_s7 + $0x10] sm:$0xff] %vm227_vm2, %v657_v8  ;;  %662 = vst.msk [vmem:[%s962_s7 + $0x18] sm:$0xff] %vm227_vm2, %v658_v9 }

</bundles_post_ra>
